<compile_context>
chip_gen: v5e
topology: v5e:2x2
jax: 0.10.0
libtpu: 0.0.40
codegen_flags: <defaults>
</compile_context>

<pallas_src>
import functools

import jax
import jax.numpy as jnp
from jax.experimental import pallas as pl
from jax.experimental.pallas import tpu as pltpu

ESP = 1e-08
LANES = 128
SUBLANES = 8
CHUNK_ROWS = 64          # rows per in-kernel accumulation chunk (32 KiB f32)
MAX_TILE_ROWS = 4096     # 4096 * 128 * 4B = 2 MiB per f32 input block


def _cdiv(a, b):
    return -(-a // b)


def _round_up(a, b):
    return _cdiv(a, b) * b


def _fidelity_partial_kernel(p_ref, g_ref, out_ref, *, tile_rows, chunk_rows,
                             total_rows, needs_mask):
    """One grid step: (8, 128) f32 partial sum of the fidelity loss over its tile.

    p_ref, g_ref : VMEM blocks (tile_rows, 128), original dtype
    out_ref      : VMEM (8, 128) per-tile partial sum (f32)
    Static params (Python ints / bool):
      tile_rows   rows per block (multiple of chunk_rows)
      chunk_rows  rows per accumulation chunk (multiple of 8)
      total_rows  valid rows of the whole 2-D slab
      needs_mask  True iff some block extends past total_rows
    """
    tile_base = pl.program_id(0) * tile_rows
    n_chunks = tile_rows // chunk_rows

    def body(c, acc):
        r = pl.multiple_of(c * chunk_rows, chunk_rows)
        p = p_ref[pl.ds(r, chunk_rows), :].astype(jnp.float32)
        g = g_ref[pl.ds(r, chunk_rows), :].astype(jnp.float32)
        loss = 1.0 - (jnp.sqrt(p * g + ESP) +
                      jnp.sqrt((1.0 - p) * (1.0 - g) + ESP))
        if needs_mask:
            # Zero rows past the logical array (a partial last block holds
            # unspecified data; jnp.where is a select so nothing leaks).
            row = jax.lax.broadcasted_iota(jnp.int32, loss.shape, 0)
            loss = jnp.where(tile_base + r + row < total_rows, loss, 0.0)
        # (chunk_rows,128) -> (chunk_rows//8, 8, 128): per-vreg adds on the VPU.
        return acc + jnp.sum(
            loss.reshape(chunk_rows // SUBLANES, SUBLANES, LANES), axis=0)

    unroll = 2 if (n_chunks >= 2 and n_chunks % 2 == 0) else 1
    acc = jax.lax.fori_loop(0, n_chunks, body,
                            jnp.zeros((SUBLANES, LANES), jnp.float32),
                            unroll=unroll)
    out_ref[...] = acc


def fidelity_loss(p, g):
    """Pallas equivalent of Fidelity_Loss.forward(p, g). Returns an f32 scalar."""
    p_flat = jnp.reshape(p, (-1,))
    g_flat = jnp.reshape(g, (-1,))
    n = p_flat.shape[0]
    assert g_flat.shape[0] == n, "p and g must have the same number of elements"
    assert n > 0, "mean over zero elements is undefined"

    rows = n // LANES          # complete 128-element rows -> Pallas kernel
    tail = n - rows * LANES    # ragged remainder (< 128 elems) -> plain JAX

    total = jnp.float32(0.0)

    if rows > 0:
        n_main = rows * LANES
        if tail:
            p_main = jax.lax.slice(p_flat, (0,), (n_main,))
            g_main = jax.lax.slice(g_flat, (0,), (n_main,))
        else:
            p_main, g_main = p_flat, g_flat
        p2 = p_main.reshape(rows, LANES)
        g2 = g_main.reshape(rows, LANES)

        # Tile size: multiple of CHUNK_ROWS, capped at MAX_TILE_ROWS (8 MiB of
        # double-buffered f32 inputs fits every generation's default scoped
        # VMEM), and sized from rows/2 so mid-sized inputs still produce >= 2
        # grid tiles for the v7x megacore split.
        tile_rows = min(MAX_TILE_ROWS, _round_up(_cdiv(rows, 2), CHUNK_ROWS))
        num_tiles = _cdiv(rows, tile_rows)
        needs_mask = (num_tiles * tile_rows) != rows

        kernel = functools.partial(
            _fidelity_partial_kernel,
            tile_rows=tile_rows,
            chunk_rows=CHUNK_ROWS,
            total_rows=rows,
            needs_mask=needs_mask,
        )

        partials = pl.pallas_call(
            kernel,
            out_shape=jax.ShapeDtypeStruct((num_tiles * SUBLANES, LANES),
                                           jnp.float32),
            grid=(num_tiles,),
            in_specs=[
                pl.BlockSpec((tile_rows, LANES), lambda i: (i, 0)),
                pl.BlockSpec((tile_rows, LANES), lambda i: (i, 0)),
            ],
            out_specs=pl.BlockSpec((SUBLANES, LANES), lambda i: (i, 0)),
            compiler_params=pltpu.CompilerParams(
                dimension_semantics=("parallel",),  # independent tiles
            ),
        )(p2, g2)
        # Single cross-lane reduce outside the hot loop. f32 accumulation; for
        # N ~ 1e8+ consider an f64 final reduce if drift beyond 1e-5 matters.
        total = total + jnp.sum(partials)

    if tail:
        pt = jax.lax.slice(p_flat, (rows * LANES,), (n,)).astype(jnp.float32)
        gt = jax.lax.slice(g_flat, (rows * LANES,), (n,)).astype(jnp.float32)
        tail_loss = 1.0 - (jnp.sqrt(pt * gt + ESP) +
                           jnp.sqrt((1.0 - pt) * (1.0 - gt) + ESP))
        total = total + jnp.sum(tail_loss)

    return total / jnp.float32(n)


def fidelity_loss_ref(p, g):
    """Pure-JAX reference for validation."""
    p = jnp.reshape(p, (-1, 1)).astype(jnp.float32)
    g = jnp.reshape(g, (-1, 1)).astype(jnp.float32)
    loss = 1.0 - (jnp.sqrt(p * g + ESP) + jnp.sqrt((1.0 - p) * (1.0 - g) + ESP))
    return jnp.mean(loss)


if __name__ == "__main__":
    key = jax.random.PRNGKey(0)
    kp, kg = jax.random.split(key)

    # Probability-like per-pixel score maps, (batch, channels, H, W); N = 2048.
    p = jax.random.uniform(kp, (2, 4, 16, 16), dtype=jnp.float32)
    g = jax.random.uniform(kg, (2, 4, 16, 16), dtype=jnp.float32)
    out = jax.block_until_ready(fidelity_loss(p, g))
    ref = jax.block_until_ready(fidelity_loss_ref(p, g))
    assert jnp.allclose(out, ref, atol=1e-5, rtol=1e-5), (out, ref)

    # Ragged element count (N = 1323): exercises the partial-block mask and
    # the <128-element pure-JAX tail.
    kp2, kg2 = jax.random.split(kg)
    p2 = jax.random.uniform(kp2, (3, 7, 63), dtype=jnp.float32)
    g2 = jax.random.uniform(kg2, (3, 7, 63), dtype=jnp.float32)
    out2 = jax.block_until_ready(fidelity_loss(p2, g2))
    ref2 = jax.block_until_ready(fidelity_loss_ref(p2, g2))
    assert jnp.allclose(out2, ref2, atol=1e-5, rtol=1e-5), (out2, ref2)

    # Aligned multi-tile / multi-chunk path (N = 32768 -> 2 tiles, maskless).
    kp3, kg3 = jax.random.split(kg2)
    p3 = jax.random.uniform(kp3, (64, 512), dtype=jnp.float32)
    g3 = jax.random.uniform(kg3, (64, 512), dtype=jnp.float32)
    out3 = jax.block_until_ready(fidelity_loss(p3, g3))
    ref3 = jax.block_until_ready(fidelity_loss_ref(p3, g3))
    assert jnp.allclose(out3, ref3, atol=1e-5, rtol=1e-5), (out3, ref3)

    print("KERNEL_OK")
</pallas_src>

<mosaic_0001>
module attributes {stable_mosaic.version = 11 : i64} {
  func.func @_fidelity_partial_kernel(%arg0: i32, %arg1: memref<64x128xf32, #tpu.memory_space<vmem>>, %arg2: memref<64x128xf32, #tpu.memory_space<vmem>>, %arg3: memref<8x128xf32, #tpu.memory_space<vmem>>) attributes {dimension_semantics = [#tpu.dimension_semantics<parallel>], iteration_bounds = array<i64: 1>, scalar_prefetch = 0 : i64, scratch_operands = 0 : i64, tpu.core_type = #tpu.core_type<tc>, window_params = [{transform_indices = @transform_0, window_bounds = array<i64: 64, 128>}, {transform_indices = @transform_1, window_bounds = array<i64: 64, 128>}, {transform_indices = @transform_2, window_bounds = array<i64: 8, 128>}]} {
    %c64_i32 = arith.constant 64 : i32
    %0 = arith.muli %arg0, %c64_i32 : i32
    %cst = arith.constant 0.000000e+00 : f32
    %1 = vector.broadcast %cst : f32 to vector<8x128xf32>
    %c0_i32 = arith.constant 0 : i32
    %c64_i32_0 = arith.constant 64 : i32
    %2 = arith.muli %c0_i32, %c64_i32_0 : i32
    %3 = tpu.assume_multiple %2, 64 : i32
    %4 = arith.index_cast %3 : i32 to index
    %c0 = arith.constant 0 : index
    %5 = vector.load %arg1[%4, %c0] : memref<64x128xf32, #tpu.memory_space<vmem>>, vector<64x128xf32>
    %6 = arith.index_cast %3 : i32 to index
    %c0_1 = arith.constant 0 : index
    %7 = vector.load %arg2[%6, %c0_1] : memref<64x128xf32, #tpu.memory_space<vmem>>, vector<64x128xf32>
    %8 = arith.mulf %5, %7 : vector<64x128xf32>
    %cst_2 = arith.constant 9.99999993E-9 : f32
    %9 = vector.broadcast %cst_2 : f32 to vector<64x128xf32>
    %10 = arith.addf %8, %9 : vector<64x128xf32>
    %11 = math.sqrt %10 : vector<64x128xf32>
    %cst_3 = arith.constant 1.000000e+00 : f32
    %12 = vector.broadcast %cst_3 : f32 to vector<64x128xf32>
    %13 = arith.subf %12, %5 : vector<64x128xf32>
    %cst_4 = arith.constant 1.000000e+00 : f32
    %14 = vector.broadcast %cst_4 : f32 to vector<64x128xf32>
    %15 = arith.subf %14, %7 : vector<64x128xf32>
    %16 = arith.mulf %13, %15 : vector<64x128xf32>
    %cst_5 = arith.constant 9.99999993E-9 : f32
    %17 = vector.broadcast %cst_5 : f32 to vector<64x128xf32>
    %18 = arith.addf %16, %17 : vector<64x128xf32>
    %19 = math.sqrt %18 : vector<64x128xf32>
    %20 = arith.addf %11, %19 : vector<64x128xf32>
    %cst_6 = arith.constant 1.000000e+00 : f32
    %21 = vector.broadcast %cst_6 : f32 to vector<64x128xf32>
    %22 = arith.subf %21, %20 : vector<64x128xf32>
    %23 = tpu.iota {dimensions = array<i32: 0>} : vector<64x128xi32>
    %24 = arith.addi %0, %3 : i32
    %25 = vector.broadcast %24 : i32 to vector<64x128xi32>
    %26 = arith.addi %25, %23 : vector<64x128xi32>
    %c16_i32 = arith.constant 16 : i32
    %27 = vector.broadcast %c16_i32 : i32 to vector<64x128xi32>
    %28 = arith.cmpi slt, %26, %27 : vector<64x128xi32>
    %cst_7 = arith.constant 0.000000e+00 : f32
    %29 = vector.broadcast %cst_7 : f32 to vector<64x128xf32>
    %30 = arith.select %28, %22, %29 : vector<64x128xi1>, vector<64x128xf32>
    %31 = vector.shape_cast %30 : vector<64x128xf32> to vector<8x8x128xf32>
    %cst_8 = arith.constant dense<0.000000e+00> : vector<8x128xf32>
    %32 = vector.multi_reduction <add>, %31, %cst_8 [0] : vector<8x8x128xf32> to vector<8x128xf32>
    %33 = arith.addf %1, %32 : vector<8x128xf32>
    %c1_i32 = arith.constant 1 : i32
    %c0_9 = arith.constant 0 : index
    %c0_10 = arith.constant 0 : index
    %34 = vector.load %arg3[%c0_9, %c0_10] : memref<8x128xf32, #tpu.memory_space<vmem>>, vector<8x128xf32>
    tpu.vector_store %arg3[%c0_9, %c0_10], %33 {strides = array<i32>} : memref<8x128xf32, #tpu.memory_space<vmem>>, vector<8x128xf32>,
    return
  }
  func.func @transform_0(%arg0: i32) -> (i32, i32) {
    %c0_i32 = arith.constant 0 : i32
    %c0_i32_0 = arith.constant 0 : i32
    return %arg0, %c0_i32 : i32, i32
  }
  func.func @transform_1(%arg0: i32) -> (i32, i32) {
    %c0_i32 = arith.constant 0 : i32
    %c0_i32_0 = arith.constant 0 : i32
    return %arg0, %c0_i32 : i32, i32
  }
  func.func @transform_2(%arg0: i32) -> (i32, i32) {
    %c0_i32 = arith.constant 0 : i32
    %c0_i32_0 = arith.constant 0 : i32
    return %arg0, %c0_i32 : i32, i32
  }
}

</mosaic_0001>

<bundles_post_ra>
// kernel: tpu_custom_call.1
= control target key start
LH: loop header
LB: loop body
LE: loop exit
PB: predicated region body
PF: predicated region fallthrough
CT: control target
= control target key end

     0   :  { %7 = vsyncpa [#allocation3], 0  ;;  %s500_s0 = inlined_call_operand.hbm [shape: f32[16,128], index: 0, kind: input, shape index: {}]   ;;  %s501_s1 = inlined_call_operand.hbm [shape: f32[16,128], index: 1, kind: input, shape index: {}]   ;;  %s502_s2 = inlined_call_operand.hbm [shape: f32[8,128], index: 2, kind: output, shape index: {}]  }
   0x1   :  { %8 = vsyncpa [#allocation6], 0 }
   0x2   :  { %9 = vsyncpa [#allocation4], 0 }
   0x3   :  { %13 = vsyncadd [#allocation3], 768  ;;  %s14_s11 = sshll.u32 %s500_s0, 4  ;;  %s470_s12 = smov [#allocation2]   ;;  %s15_s11 = int_to_ptr.hbm [resolvable:$true] %s14_s11 }
   0x4   :  { %s16_s13 = sshll.u32 %s470_s12, 4  ;;  %s471_s14 = smov 128   ;;  %s17_s13 = int_to_ptr.vmem [resolvable:$true] %s16_s13 }
   0x5   :  { %s472_s15 = smov 8  }
   0x6   :  { %22 = dma.hbm_to_vmem [thread:$0]  %s15_s11, 256, %s17_s13, [#allocation3], %s471_s14, %s471_s14, %s472_s15  }
   0x7   :  { %26 = vsyncadd [#allocation6], 768  ;;  %s27_s18 = sshll.u32 %s501_s1, 4  ;;  %s473_s19 = smov [#allocation5]   ;;  %s28_s18 = int_to_ptr.hbm [resolvable:$true] %s27_s18 }
   0x8   :  { %s29_s20 = sshll.u32 %s473_s19, 4  ;;  %s30_s20 = int_to_ptr.vmem [resolvable:$true] %s29_s20 }
   0x9   :  { %35 = dma.hbm_to_vmem [thread:$0]  %s28_s18, 256, %s30_s20, [#allocation6], %s471_s14, %s471_s14, %s472_s15  }
   0xa   :  { %464 = dma.done.wait [#allocation3], 1024  }
   0xb   :  { %465 = vsyncadd [#allocation3], 4294966272 }
   0xc   :  { %466 = dma.done.wait [#allocation6], 1024  }
   0xd   :  { %467 = vsyncadd [#allocation6], 4294966272  ;;  %v45_v0 = vld [vmem:[#allocation2] sm:$0xff]  ;;  %v46_v1 = vld [vmem:[#allocation2 + $0x8] sm:$0xff]  ;;  %s474_s0 = smov [#allocation7]   ;;  %s368_s23 = sshll.u32 %s502_s2, 4  ;;  %s369_s23 = int_to_ptr.hbm [resolvable:$true] %s368_s23 }
   0xe   :  { %v53_v2 = vld [vmem:[#allocation5] sm:$0xff]  ;;  %v54_v3 = vld [vmem:[#allocation5 + $0x8] sm:$0xff]  ;;  %v173_v5 = vsub.f32 1.0, %v45_v0  ;;  %v174_v6 = vsub.f32 1.0, %v46_v1  ;;  %s366_s1 = sshll.u32 %s474_s0, 4  ;;  %s367_s1 = int_to_ptr.vmem [resolvable:$true] %s366_s1 }
   0xf   :  { %v61_v4 = vmul.f32 %v53_v2, %v45_v0  ;;  %v181_v7 = vsub.f32 1.0, %v53_v2  ;;  %v62_v8 = vmul.f32 %v54_v3, %v46_v1  ;;  %v182_v9 = vsub.f32 1.0, %v54_v3 }
  0x11   :  { %v69_v10 = vadd.f32 1e-08, %v61_v4  ;;  %v189_v11 = vmul.f32 %v181_v7, %v173_v5  ;;  %v70_v12 = vadd.f32 1e-08, %v62_v8  ;;  %v190_v13 = vmul.f32 %v182_v9, %v174_v6 }
  0x13   :  { %384 = vrsqrt.f32 %v69_v10  ;;  %v197_v14 = vadd.f32 1e-08, %v189_v11  ;;  %v198_v15 = vadd.f32 1e-08, %v190_v13  ;;  %vm84_vm0 = vcmp.eq.f32.partialorder %v69_v10, inf }
  0x14   :  { %386 = vrsqrt.f32 %v70_v12  ;;  %vm96_vm1 = vcmp.eq.f32.partialorder %v70_v12, inf  ;;  %vm86_vm2 = vcmp.eq.f32.partialorder %v69_v10, 0.0  ;;  %v87_v38 = vand.u32 2147483648, %v69_v10 }
  0x15   :  { %388 = vrsqrt.f32 %v197_v14  ;;  %vm98_vm3 = vcmp.eq.f32.partialorder %v70_v12, 0.0  ;;  %v99_v42 = vand.u32 2147483648, %v70_v12  ;;  %vm212_vm4 = vcmp.eq.f32.partialorder %v197_v14, inf }
  0x16   :  { %390 = vrsqrt.f32 %v198_v15  ;;  %v215_v45 = vand.u32 2147483648, %v197_v14  ;;  %vm214_vm5 = vcmp.eq.f32.partialorder %v197_v14, 0.0  ;;  %vm224_vm6 = vcmp.eq.f32.partialorder %v198_v15, inf }
  0x17   :  { %v227_v48 = vand.u32 2147483648, %v198_v15  ;;  %vm226_vm7 = vcmp.eq.f32.partialorder %v198_v15, 0.0 }
  0x19   :  { %v385_v16 = vpop.eup %384 }
  0x1a   :  { %v387_v17 = vpop.eup %386  ;;  %v78_v18 = vmul.f32 %v385_v16, %v69_v10 }
  0x1b   :  { %v90_v19 = vmul.f32 %v387_v17, %v70_v12  ;;  %v389_v21 = vpop.eup %388 }
  0x1c   :  { %v79_v20 = vmul.f32 %v385_v16, %v78_v18  ;;  %v391_v23 = vpop.eup %390  ;;  %v206_v25 = vmul.f32 %v389_v21, %v197_v14 }
  0x1d   :  { %v91_v22 = vmul.f32 %v387_v17, %v90_v19  ;;  %v218_v27 = vmul.f32 %v391_v23, %v198_v15 }
  0x1e   :  { %v80_v24 = vmul.f32 0.5, %v79_v20  ;;  %v207_v29 = vmul.f32 %v389_v21, %v206_v25 }
  0x1f   :  { %v92_v26 = vmul.f32 0.5, %v91_v22  ;;  %v219_v31 = vmul.f32 %v391_v23, %v218_v27 }
  0x20   :  { %v81_v28 = vsub.f32 1.5, %v80_v24  ;;  %v208_v33 = vmul.f32 0.5, %v207_v29 }
  0x21   :  { %v93_v30 = vsub.f32 1.5, %v92_v26  ;;  %v220_v35 = vmul.f32 0.5, %v219_v31 }
  0x22   :  { %v82_v32 = vmul.f32 %v385_v16, %v81_v28  ;;  %v209_v37 = vsub.f32 1.5, %v208_v33 }
  0x23   :  { %v94_v34 = vmul.f32 %v387_v17, %v93_v30  ;;  %v221_v40 = vsub.f32 1.5, %v220_v35 }
  0x24   :  { %v83_v36 = vmul.f32 %v82_v32, %v69_v10  ;;  %v210_v43 = vmul.f32 %v389_v21, %v209_v37 }
  0x25   :  { %v95_v39 = vmul.f32 %v94_v34, %v70_v12  ;;  %v222_v46 = vmul.f32 %v391_v23, %v221_v40 }
  0x26   :  { %v85_v41 = vsel %vm84_vm0, %v69_v10, %v83_v36  ;;  %v211_v47 = vmul.f32 %v210_v43, %v197_v14 }
  0x27   :  { %v97_v44 = vsel %vm96_vm1, %v70_v12, %v95_v39  ;;  %v88_v49 = vsel %vm86_vm2, %v87_v38, %v85_v41  ;;  %v223_v50 = vmul.f32 %v222_v46, %v198_v15 }
  0x28   :  { %v100_v51 = vsel %vm98_vm3, %v99_v42, %v97_v44  ;;  %v213_v52 = vsel %vm212_vm4, %v197_v14, %v211_v47 }
  0x29   :  { %v216_v53 = vsel %vm214_vm5, %v215_v45, %v213_v52  ;;  %v225_v54 = vsel %vm224_vm6, %v198_v15, %v223_v50 }
  0x2a   :  { %v228_v55 = vsel %vm226_vm7, %v227_v48, %v225_v54  ;;  %v301_v56 = vadd.f32 %v216_v53, %v88_v49 }
  0x2b   :  { %v302_v57 = vadd.f32 %v228_v55, %v100_v51 }
  0x2c   :  { %v309_v58 = vsub.f32 1.0, %v301_v56 }
  0x2d   :  { %v310_v59 = vsub.f32 1.0, %v302_v57 }
  0x2f   :  { %v352_v60 = vadd.f32 %v310_v59, %v309_v58 }
  0x31   :  { %360 = vst [vmem:[#allocation7] sm:$0xff] %v352_v60 }
  0x32   :  { %371 = dma.vmem_to_hbm [thread:$0]  %s367_s1, 128, %s369_s23, [#allocation4]  }
  0x33   :  { %468 = dma.done.wait [#allocation4], 128  }
  0x34   :  { %469 = vsyncadd [#allocation4], 4294967168 }
  0x35   :  { %376 = vsyncpa [#allocation3], 1 }
  0x36   :  { %377 = vsyncpa [#allocation6], 1 }
  0x37   :  { %378 = vsyncpa [#allocation4], 1 }

</bundles_post_ra>
